<compile_context>
chip_gen: v7x
topology: tpu7x:2x2x1
jax: 0.10.0
libtpu: 0.0.40
codegen_flags: <defaults>
</compile_context>

<pallas_src>
import jax
import jax.numpy as jnp
from jax import lax
from jax.experimental import pallas as pl
from jax.experimental.pallas import tpu as pltpu

IN_FEATURES = 28 * 28   # 784
OUT_FEATURES = 10

# Default batch tile: safe on every generation's default scoped-VMEM limit.
# (2 buffers x TB x 784 x 4 B  ->  TB=1024 ~ 6.4 MiB; TB=2048 ~ 12.8 MiB.)
TB_MAX_DEFAULT = 1024


def linear_kernel(x_ref, w_ref, b_ref, o_ref):
    # x_ref: (TB, 784)   VMEM (streamed, double-buffered per grid step)
    # w_ref: (10, 784)   VMEM (resident across all grid steps)
    # b_ref: (1, 10)     VMEM (resident)
    # o_ref: (TB, 10)    VMEM
    # Contract x dim 1 against weight dim 1 (i.e. x @ W^T) on the MXU,
    # accumulating in f32.
    acc = lax.dot_general(
        x_ref[...], w_ref[...],
        dimension_numbers=(((1,), (1,)), ((), ())),
        preferred_element_type=jnp.float32,
    )
    o_ref[...] = (acc + b_ref[...]).astype(o_ref.dtype)


def linear_pallas(x, weight, bias, *, tb_max=TB_MAX_DEFAULT):
    """Equivalent of torch.nn.Linear(784, 10): out = x @ weight.T + bias.

    x:      (B, 784)
    weight: (10, 784)   (PyTorch layout, not transposed)
    bias:   (10,)
    """
    B = x.shape[0]
    itemsize = jnp.dtype(x.dtype).itemsize

    # Pick a batch tile: multiple of 8 (sublane), capped at tb_max, and pad B
    # up so the grid divides evenly (padded rows are sliced off afterwards).
    b_pad8 = ((B + 7) // 8) * 8
    tb = min(b_pad8, tb_max)
    b_padded = ((b_pad8 + tb - 1) // tb) * tb
    if b_padded != B:
        x = jnp.pad(x, ((0, b_padded - B), (0, 0)))

    b2 = bias.reshape(1, OUT_FEATURES)  # 2-D for in-kernel broadcast

    # NOTE: for genuinely tiny B (e.g. a handful of rows) a plain jnp.dot is
    # as fast or faster than any Pallas kernel; the Pallas path is kept here
    # so the kernel itself is exercised.
    # NOTE: if the model tolerates bf16 activations/weights, feeding bf16 here
    # (accumulate stays f32 via preferred_element_type) is a near-2x win since
    # the kernel is HBM-bandwidth-bound on streaming x.

    cost = pl.CostEstimate(
        flops=2 * b_padded * IN_FEATURES * OUT_FEATURES,
        transcendentals=0,
        bytes_accessed=(b_padded * IN_FEATURES * itemsize
                        + OUT_FEATURES * IN_FEATURES * itemsize
                        + b_padded * OUT_FEATURES * itemsize),
    )

    out = pl.pallas_call(
        linear_kernel,
        out_shape=jax.ShapeDtypeStruct((b_padded, OUT_FEATURES), x.dtype),
        grid_spec=pltpu.PrefetchScalarGridSpec(
            num_scalar_prefetch=0,
            grid=(b_padded // tb,),
            in_specs=[
                pl.BlockSpec((tb, IN_FEATURES), lambda i: (i, 0)),           # x tile
                pl.BlockSpec((OUT_FEATURES, IN_FEATURES), lambda i: (0, 0)),  # weight (resident)
                pl.BlockSpec((1, OUT_FEATURES), lambda i: (0, 0)),            # bias (resident)
            ],
            out_specs=pl.BlockSpec((tb, OUT_FEATURES), lambda i: (i, 0)),
        ),
        compiler_params=pltpu.CompilerParams(
            dimension_semantics=("parallel",)),
        cost_estimate=cost,
    )(x, weight, b2)

    return out[:B] if b_padded != B else out


if __name__ == "__main__":
    key = jax.random.PRNGKey(0)
    kx, kw, kb = jax.random.split(key, 3)

    # Small batch consistent with an MNIST-style flattened input (B, 784).
    B = 8
    x = jax.random.normal(kx, (B, IN_FEATURES), dtype=jnp.float32)

    # Deterministic parameter init mimicking nn.Linear's uniform(-1/sqrt(fan_in), +).
    bound = 1.0 / jnp.sqrt(jnp.float32(IN_FEATURES))
    weight = jax.random.uniform(kw, (OUT_FEATURES, IN_FEATURES),
                                minval=-bound, maxval=bound, dtype=jnp.float32)
    bias = jax.random.uniform(kb, (OUT_FEATURES,),
                              minval=-bound, maxval=bound, dtype=jnp.float32)

    out = linear_pallas(x, weight, bias)
    out = jax.block_until_ready(out)

    # Sanity check against plain-JAX reference.
    ref = x @ weight.T + bias
    assert out.shape == (B, OUT_FEATURES)
    assert jnp.allclose(out, ref, atol=1e-5, rtol=1e-5)

    # Also exercise a non-tile-aligned, multi-tile batch to validate tiling/padding.
    B2 = 2500
    x2 = jax.random.normal(kx, (B2, IN_FEATURES), dtype=jnp.float32)
    out2 = jax.block_until_ready(linear_pallas(x2, weight, bias))
    ref2 = x2 @ weight.T + bias
    assert out2.shape == (B2, OUT_FEATURES)
    assert jnp.allclose(out2, ref2, atol=1e-4, rtol=1e-5)

    print("KERNEL_OK")
</pallas_src>

<mosaic_0001>
module attributes {stable_mosaic.version = 11 : i64} {
  func.func @linear_kernel(%arg0: i32, %arg1: memref<8x784xf32, #tpu.memory_space<vmem>>, %arg2: memref<10x784xf32, #tpu.memory_space<vmem>>, %arg3: memref<1x10xf32, #tpu.memory_space<vmem>>, %arg4: memref<8x10xf32, #tpu.memory_space<vmem>>) attributes {dimension_semantics = [#tpu.dimension_semantics<parallel>], iteration_bounds = array<i64: 1>, scalar_prefetch = 0 : i64, scratch_operands = 0 : i64, tpu.core_type = #tpu.core_type<tc>, window_params = [{transform_indices = @transform_0, window_bounds = array<i64: 8, 784>}, {pipeline_mode = #tpu.pipeline_mode<synchronous>, transform_indices = @transform_1, window_bounds = array<i64: 10, 784>}, {pipeline_mode = #tpu.pipeline_mode<synchronous>, transform_indices = @transform_2, window_bounds = array<i64: 1, 10>}, {transform_indices = @transform_3, window_bounds = array<i64: 8, 10>}]} {
    %c0 = arith.constant 0 : index
    %c0_0 = arith.constant 0 : index
    %0 = vector.load %arg1[%c0, %c0_0] : memref<8x784xf32, #tpu.memory_space<vmem>>, vector<8x784xf32>
    %c0_1 = arith.constant 0 : index
    %c0_2 = arith.constant 0 : index
    %1 = vector.load %arg2[%c0_1, %c0_2] : memref<10x784xf32, #tpu.memory_space<vmem>>, vector<10x784xf32>
    %cst = arith.constant dense<0.000000e+00> : vector<8x10xf32>
    %2 = tpu.matmul %0, %1, %cst {dimension_numbers = #tpu.dot_dimension_numbers<[1], [1], [0], [0], [0, 0, 1, 0], [], []>} : vector<8x784xf32>, vector<10x784xf32>, vector<8x10xf32> -> vector<8x10xf32>
    %c0_3 = arith.constant 0 : index
    %c0_4 = arith.constant 0 : index
    %3 = vector.load %arg3[%c0_3, %c0_4] : memref<1x10xf32, #tpu.memory_space<vmem>>, vector<1x10xf32>
    %4 = vector.broadcast %3 : vector<1x10xf32> to vector<8x10xf32>
    %5 = arith.addf %2, %4 : vector<8x10xf32>
    %c0_5 = arith.constant 0 : index
    %c0_6 = arith.constant 0 : index
    %6 = vector.load %arg4[%c0_5, %c0_6] : memref<8x10xf32, #tpu.memory_space<vmem>>, vector<8x10xf32>
    tpu.vector_store %arg4[%c0_5, %c0_6], %5 {strides = array<i32>} : memref<8x10xf32, #tpu.memory_space<vmem>>, vector<8x10xf32>,
    return
  }
  func.func @transform_0(%arg0: i32) -> (i32, i32) {
    %c0_i32 = arith.constant 0 : i32
    %c0_i32_0 = arith.constant 0 : i32
    return %arg0, %c0_i32 : i32, i32
  }
  func.func @transform_1(%arg0: i32) -> (i32, i32) {
    %c0_i32 = arith.constant 0 : i32
    %c0_i32_0 = arith.constant 0 : i32
    %c0_i32_1 = arith.constant 0 : i32
    return %c0_i32, %c0_i32_0 : i32, i32
  }
  func.func @transform_2(%arg0: i32) -> (i32, i32) {
    %c0_i32 = arith.constant 0 : i32
    %c0_i32_0 = arith.constant 0 : i32
    %c0_i32_1 = arith.constant 0 : i32
    return %c0_i32, %c0_i32_0 : i32, i32
  }
  func.func @transform_3(%arg0: i32) -> (i32, i32) {
    %c0_i32 = arith.constant 0 : i32
    %c0_i32_0 = arith.constant 0 : i32
    return %arg0, %c0_i32 : i32, i32
  }
}

</mosaic_0001>

<bundles_post_ra>
// kernel: tpu_custom_call.1
= control target key start
LH: loop header
LB: loop body
LE: loop exit
PB: predicated region body
PF: predicated region fallthrough
CT: control target
= control target key end

     0   :  { %8 = vsyncpa [#allocation3], 0  ;;  %s570_s0 = inlined_call_operand.hbm [shape: f32[8,784], index: 0, kind: input, shape index: {}]   ;;  %s571_s1 = inlined_call_operand.hbm [shape: f32[10,784], index: 1, kind: input, shape index: {}]   ;;  %s572_s2 = inlined_call_operand.vmem [shape: f32[1,10], index: 2, kind: input, shape index: {}]   ;;  %s573_s3 = inlined_call_operand.hbm [shape: f32[8,10], index: 3, kind: output, shape index: {}]  }
   0x1   :  { %9 = vsyncpa [#allocation6], 0 }
   0x2   :  { %10 = vsyncpa [#allocation4], 0  ;;  %s493_s12 = smov [#allocation2]   ;;  %s494_s14 = smov [#allocation5]  }
   0x3   :  { %s17_s13 = sshll.u32 %s493_s12, 4  ;;  %s26_s15 = sshll.u32 %s494_s14, 4  ;;  %s18_s13 = int_to_ptr.vmem [resolvable:$true] %s17_s13  ;;  %s521_s15 = int_to_ptr.vmem [resolvable:$true] %s26_s15 }
   0x4   :  { %s421_s18 = scalar_lea.hbm %s570_s0, 896 }
   0x5   :  { %p422_p0 = scmp.ne.s32.totalorder %s570_s0, %s421_s18  ;;  %p425_p1 = scmp.lt.u32.totalorder %s421_s18, %s570_s0 }
   0x7   :  { %p427_p2 = pnand %p425_p1, %p422_p0 }
   0x9   :  { %430 = shalt.err (!%p427_p2)
}
   0xa   :  { %s431_s23 = scalar_lea.vmem %s18_s13, 896  ;;  %p436_p4 = scmp.lt.s32.totalorder %s18_s13, %s18_s13 }
   0xb   :  { %p432_p3 = scmp.ne.s32.totalorder %s18_s13, %s431_s23  ;;  %p437_p5 = scmp.lt.s32.totalorder %s431_s23, %s431_s23 }
   0xd   :  { %p438_p6 = por %p437_p5, %p436_p4 }
   0xf   :  { %p439_p7 = pnand %p438_p6, %p432_p3 }
  0x11   :  { %442 = shalt.err (!%p439_p7)
}
  0x12   :  { %20 = dma.hbm_to_vmem [thread:$0]  %s570_s0, 896, %s18_s13, [#allocation3]  }
  0x13   :  { %s443_s28 = scalar_lea.hbm %s571_s1, 1792 }
  0x14   :  { %p444_p8 = scmp.ne.s32.totalorder %s571_s1, %s443_s28  ;;  %p447_p9 = scmp.lt.u32.totalorder %s443_s28, %s571_s1 }
  0x16   :  { %p449_p10 = pnand %p447_p9, %p444_p8 }
  0x18   :  { %452 = shalt.err (!%p449_p10)
}
  0x19   :  { %s453_s6 = scalar_lea.vmem %s521_s15, 1792  ;;  %p458_p12 = scmp.lt.s32.totalorder %s521_s15, %s521_s15 }
  0x1a   :  { %p454_p11 = scmp.ne.s32.totalorder %s521_s15, %s453_s6  ;;  %p459_p13 = scmp.lt.s32.totalorder %s453_s6, %s453_s6 }
  0x1c   :  { %p460_p0 = por %p459_p13, %p458_p12 }
  0x1e   :  { %p461_p1 = pnand %p460_p0, %p454_p11 }
  0x20   :  { %464 = shalt.err (!%p461_p1)
}
  0x21   :  { %s495_s0 = smov 896   ;;  %s496_s7 = smov 56  }
  0x22   :  { %32 = dma.hbm_to_vmem [thread:$0]  %s571_s1, 1792, %s521_s15, [#allocation6], %s495_s0, %s495_s0, %s496_s7  }
  0x23   :  { %487 = dma.done.wait [#allocation3], 896  }
  0x24   :  { %488 = vsyncadd [#allocation3], 4294966400 }
  0x25   :  { %489 = dma.done.wait [#allocation6], 1792  }
  0x26   :  { %490 = vsyncadd [#allocation6], 4294965504  ;;  %v49_v0 = vld [vmem:[#allocation5 + $0x8] sm:$0xff]  ;;  %v56_v1 = vld [vmem:[#allocation5 + $0x40] sm:$0x3]  ;;  %v497_v19 = vmov 0.0|0.0  }
  0x27   :  { %v53_v2 = vld [vmem:[#allocation5 + $0x28] sm:$0xff]  ;;  %v391_v3 = vpack.c.bf16 %v56_v1, %v49_v0  ;;  %v60_v4 = vld [vmem:[#allocation5 + $0x60] sm:$0x3]  ;;  %v55_v6 = vld [vmem:[#allocation5 + $0x38] sm:$0x3]  ;;  %vm69_vm0 = vcmask 130048  }
  0x28   :  { %v48_v5 = vld [vmem:[#allocation5] sm:$0xff]  ;;  %v399_v7 = vpack.c.bf16 %v60_v4, %v53_v2  ;;  %v59_v10 = vld [vmem:[#allocation5 + $0x58] sm:$0x3]  ;;  %v42_v11 = vld [vmem:[#allocation2 + $0x8] sm:$0xff]  ;;  %vm498_vm2 = vmmov 0   ;;  %v499_v27 = vmov 0.0  }
  0x29   :  { %v393_v8 = vpack.c.bf16 %v55_v6, %v48_v5  ;;  %v52_v9 = vld [vmem:[#allocation5 + $0x20] sm:$0xff]  ;;  %392 = vmatprep.subr.bf16.mxu1 %v391_v3  ;;  %143 = vmatprep.mubr.f32.mxu1 %v42_v11  ;;  %v46_v13 = vld [vmem:[#allocation2 + $0x28] sm:$0xff]  ;;  %v51_v14 = vld [vmem:[#allocation5 + $0x18] sm:$0xff]  ;;  %s500_s11 = smov [#allocation7]   ;;  %vm359_vm3 = vcmask 80896  }
  0x2a   :  { %v401_v12 = vpack.c.bf16 %v59_v10, %v52_v9  ;;  %400 = vmatprep.subr.bf16.mxu0 %v399_v7  ;;  %v58_v15 = vld [vmem:[#allocation5 + $0x50] sm:$0x3]  ;;  %283 = vmatprep.mubr.f32.mxu0 %v46_v13  ;;  %v57_v18 = vld [vmem:[#allocation5 + $0x48] sm:$0x3]  ;;  %vm405_vm1 = vmpackc.low %vm69_vm0, %vm69_vm0  ;;  %s367_s12 = sshll.u32 %s500_s11, 4  ;;  %s368_s12 = int_to_ptr.vmem [resolvable:$true] %s367_s12 }
  0x2b   :  { %394 = vmatpush1.bf16.xpose.msra.mxu1 %v393_v8  ;;  %v395_v16 = vpack.c.bf16 %v58_v15, %v51_v14  ;;  %v50_v17 = vld [vmem:[#allocation5 + $0x10] sm:$0xff]  ;;  %v61_v21 = vld [vmem:[#allocation5 + $0x68] sm:$0x3]  ;;  %v44_v26 = vld [vmem:[#allocation2 + $0x18] sm:$0xff]  ;;  %s465_s13 = scalar_lea.vmem %s368_s12, 128  ;;  %p470_p3 = scmp.lt.s32.totalorder %s368_s12, %s368_s12 }
  0x2c   :  { %402 = vmatpush1.bf16.xpose.msra.mxu0 %v401_v12  ;;  %v54_v20 = vld [vmem:[#allocation5 + $0x30] sm:$0xff]  ;;  %v41_v22 = vld [vmem:[#allocation2] sm:$0xff]  ;;  %v397_v23 = vpack.c.bf16 %v57_v18, %v50_v17  ;;  %v43_v28 = vld [vmem:[#allocation2 + $0x10] sm:$0xff]  ;;  %p466_p2 = scmp.ne.s32.totalorder %s368_s12, %s465_s13  ;;  %p471_p4 = scmp.lt.s32.totalorder %s465_s13, %s465_s13 }
  0x2d   :  { %403 = vmatprep.subr.bf16.mxu0 %v497_v19  ;;  %396 = vmatprep.subr.bf16.mxu1 %v395_v16  ;;  %v45_v24 = vld [vmem:[#allocation2 + $0x20] sm:$0xff]  ;;  %v404_v25 = vpack.c.bf16 %v61_v21, %v54_v20  ;;  %v47_v29 = vld [vmem:[#allocation2 + $0x30] sm:$0xff] }
  0x2e   :  { %v377_v30 = vld [vmem:[%s572_s2] ss:$0 sm:$0xff]  ;;  %p472_p5 = por %p471_p4, %p470_p3 }
  0x30   :  { %p473_p6 = pnand %p472_p5, %p466_p2 }
  0x32   :  { %144 = vmatmul.mubr.f32.vlgmr.msra.gmra.mrb[0].mxu1 %v41_v22 }
  0x33   :  { %284 = vmatmul.mubr.f32.vlgmr.msra.gmra.mrb[0].mxu0 %v45_v24  ;;  %398 = vmatpush1.bf16.xpose.msra.mxu1 %v397_v23 }
  0x34   :  { %406 = vmatpush3.bf16.xpose.msk.msra.mxu0 %vm405_vm1, %v404_v25  ;;  %213 = vmatprep.mubr.f32.mxu1 %v44_v26 }
  0x35   :  { %388 = vmatprep.mubr.msk.f32.mxu0 %vm498_vm2, %v499_v27 }
  0x3a   :  { %214 = vmatmul.mubr.f32.vlgmr.msra.gmra.mrb[0].mxu1 %v43_v28 }
  0x3b   :  { %389 = vmatmul.mubr.msk.f32.vlgmr.msra.gmra.mrb[0].mxu0 %vm69_vm0, %v47_v29 }
 0x10d   :  { %v215_v31 = vpop.f32.mrb[0].mxu1 }
 0x10e   :  { %v407_v32 = vadd.f32 %v377_v30, %v215_v31  ;;  %v355_v33 = vpop.f32.mrb[0].mxu0  ;;  %v217_v34 = vpop.f32.mrb[1].mxu1 }
 0x10f   :  { %v390_v35 = vpop.f32.mrb[1].mxu0 }
 0x110   :  { %v408_v36 = vadd.f32 %v407_v32, %v355_v33 }
 0x112   :  { %360 = vst.msk [vmem:[#allocation7] sm:$0xff] %vm359_vm3, %v408_v36 }
 0x113   :  { %476 = shalt.err (!%p473_p6)
}
 0x114   :  { %s477_s15 = scalar_lea.hbm %s573_s3, 128 }
 0x115   :  { %p478_p7 = scmp.ne.s32.totalorder %s573_s3, %s477_s15  ;;  %p481_p8 = scmp.lt.u32.totalorder %s477_s15, %s573_s3 }
 0x117   :  { %p483_p9 = pnand %p481_p8, %p478_p7 }
 0x119   :  { %486 = shalt.err (!%p483_p9)
}
 0x11a   :  { %370 = dma.vmem_to_hbm [thread:$0]  %s368_s12, 128, %s573_s3, [#allocation4]  }
 0x11b   :  { %491 = dma.done.wait [#allocation4], 128  }
 0x11c   :  { %492 = vsyncadd [#allocation4], 4294967168 }
 0x11d   :  { %374 = vsyncpa [#allocation3], 1 }
 0x11e   :  { %375 = vsyncpa [#allocation6], 1 }
 0x11f   :  { %376 = vsyncpa [#allocation4], 1 }

</bundles_post_ra>
